<compile_context>
chip_gen: v6e
topology: v6e:2x2x1
jax: 0.10.0
libtpu: 0.0.40
codegen_flags: <defaults>
</compile_context>

<pallas_src>
import functools

import jax
import jax.numpy as jnp
from jax.experimental import pallas as pl
from jax.experimental.pallas import tpu as pltpu


def _round_up(x, m):
    return ((x + m - 1) // m) * m


def mla_kernel(x_ref, xt_ref, bias_ref, w_ref, o_ref):
    # x_ref:    (TB, Sp, Hp) bf16  -- resident across the label-tile grid axis
    # xt_ref:   (TB, Hp, Sp) bf16  -- pre-transposed copy for the first matmul
    # bias_ref: (TB, 1,  Sp) f32   -- additive mask bias (0 valid / -1e30 masked)
    # w_ref:    (TL, Hp)     bf16  -- weight tile (amortized over the TB batch block)
    # o_ref:    (TB, TL, Hp) out dtype
    w = w_ref[...]                                      # (TL, Hp) bf16
    tb = x_ref.shape[0]
    for b in range(tb):      # static unroll; each iteration is an independent chain
        # scores[l, s] = sum_h w[l, h] * x[b, s, h]  -- canonical (M,K)x(K,N) matmul,
        # no in-kernel transpose (x^T was built once in the wrapper).
        scores = jnp.dot(w, xt_ref[b],
                         preferred_element_type=jnp.float32)        # (TL, Sp) f32
        scores = scores + bias_ref[b]                                # (1, Sp) broadcast

        # softmax over S; normalization folded into the output after the 2nd matmul.
        s_max = jnp.max(scores, axis=-1, keepdims=True)              # (TL, 1)
        p = jnp.exp(scores - s_max)                                  # (TL, Sp) f32
        denom = jnp.sum(p, axis=-1, keepdims=True)                   # (TL, 1)

        out = jnp.dot(p.astype(jnp.bfloat16), x_ref[b],
                      preferred_element_type=jnp.float32)            # (TL, Hp) f32
        o_ref[b] = (out * pl.reciprocal(denom, approx=True)).astype(o_ref.dtype)


@functools.partial(jax.jit, static_argnames=("out_dtype",))
def ml_attention(inputs, masks, weight, *, out_dtype=jnp.float32):
    """inputs: (B, S, H) f32, masks: (B, S) bool, weight: (L, H) f32 -> (B, L, H)."""
    B, S, H = inputs.shape
    L = weight.shape[0]

    Hp = _round_up(H, 128)          # lane-dense hidden dim
    Sp = _round_up(S, 128)          # lane-dense sequence / scores dim

    # Label tile: 128-aligned (matches the v5e 4x128x128 MXU) when L is large.
    if L >= 128:
        TL = min(512, _round_up(L, 128))
    else:
        TL = _round_up(max(L, 8), 8)
    # Batch block: amortizes the weight-tile HBM stream across TB batch elements.
    TB = min(B, 4)

    out_itemsize = jnp.dtype(out_dtype).itemsize

    def vmem_est(tb, tl):
        return (2 * 2 * tb * Sp * Hp * 2        # x + x_t, double-buffered bf16
                + 2 * tb * Sp * 4               # mask bias
                + 2 * tl * Hp * 2               # weight tile, double-buffered bf16
                + 2 * tb * tl * Hp * out_itemsize
                + 3 * tl * Sp * 4)              # scores / exp temporaries

    BUDGET = 40 * 1024 * 1024                   # headroom below v7x's 64 MiB VMEM
    while vmem_est(TB, TL) > BUDGET and TL > 128:
        TL //= 2
    while vmem_est(TB, TL) > BUDGET and TB > 1:
        TB //= 2

    Lp = _round_up(L, TL)
    Bp = _round_up(B, TB)

    # Wrapper-side (one-time, XLA) padding / transpose / mask-bias precompute.
    x = jnp.pad(inputs.astype(jnp.bfloat16),
                ((0, Bp - B), (0, Sp - S), (0, Hp - H)))             # (Bp, Sp, Hp)
    w = jnp.pad(weight.astype(jnp.bfloat16),
                ((0, Lp - L), (0, Hp - H)))                          # (Lp, Hp)
    x_t = jnp.transpose(x, (0, 2, 1))                                # (Bp, Hp, Sp)
    masks_p = jnp.pad(masks, ((0, Bp - B), (0, Sp - S)))             # padded -> False
    bias = jnp.where(masks_p, 0.0, -1e30).astype(jnp.float32)[:, None, :]  # (Bp, 1, Sp)

    out = pl.pallas_call(
        mla_kernel,
        out_shape=jax.ShapeDtypeStruct((Bp, Lp, Hp), out_dtype),
        grid_spec=pltpu.PrefetchScalarGridSpec(
            num_scalar_prefetch=0,
            grid=(Bp // TB, Lp // TL),
            in_specs=[
                pl.BlockSpec((TB, Sp, Hp), lambda b, l: (b, 0, 0)),  # x (resident over l)
                pl.BlockSpec((TB, Hp, Sp), lambda b, l: (b, 0, 0)),  # x^T (resident over l)
                pl.BlockSpec((TB, 1, Sp), lambda b, l: (b, 0, 0)),   # mask bias (resident)
                pl.BlockSpec((TL, Hp), lambda b, l: (l, 0)),         # weight tile
            ],
            out_specs=pl.BlockSpec((TB, TL, Hp), lambda b, l: (b, l, 0)),
        ),
        compiler_params=pltpu.CompilerParams(
            dimension_semantics=("parallel", "parallel"),
            vmem_limit_bytes=48 * 1024 * 1024),
    )(x, x_t, bias, w)

    return out[:B, :L, :H]


def reference(inputs, masks, weight):
    # pure-JAX f32 reference mirroring the PyTorch forward
    scores = jnp.einsum("bsh,lh->bls", inputs, weight)
    scores = jnp.where(masks[:, None, :], scores, -jnp.inf)
    att = jax.nn.softmax(scores, axis=-1)
    return jnp.einsum("bls,bsh->blh", att, inputs)


if __name__ == "__main__":
    B, S, H, L = 2, 16, 32, 8

    key = jax.random.PRNGKey(0)
    k_x, k_w = jax.random.split(key)

    inputs = jax.random.normal(k_x, (B, S, H), dtype=jnp.float32)

    # xavier_uniform_ init for the (labels_num, hidden_size) attention weight
    bound = (6.0 / (L + H)) ** 0.5
    weight = jax.random.uniform(k_w, (L, H), dtype=jnp.float32,
                                minval=-bound, maxval=bound)

    # masks: first sequence fully valid, second has padding after position 10
    lengths = jnp.array([16, 10], dtype=jnp.int32)
    masks = (jnp.arange(S)[None, :] < lengths[:, None])  # (B, S) bool

    out = ml_attention(inputs, masks, weight)
    out = jax.block_until_ready(out)

    ref = reference(inputs, masks, weight)
    assert out.shape == (B, L, H)
    assert out.dtype == jnp.float32
    # bf16 MXU operands (f32 accumulation) -> loosened tolerance vs f32 reference
    assert jnp.allclose(out, ref, atol=5e-2, rtol=5e-2)

    print("KERNEL_OK")
</pallas_src>

<mosaic_0001>
module attributes {stable_mosaic.version = 11 : i64} {
  func.func @mla_kernel(%arg0: i32, %arg1: i32, %arg2: memref<2x128x128xbf16, #tpu.memory_space<vmem>>, %arg3: memref<2x128x128xbf16, #tpu.memory_space<vmem>>, %arg4: memref<2x1x128xf32, #tpu.memory_space<vmem>>, %arg5: memref<8x128xbf16, #tpu.memory_space<vmem>>, %arg6: memref<2x8x128xf32, #tpu.memory_space<vmem>>) attributes {dimension_semantics = [#tpu.dimension_semantics<parallel>, #tpu.dimension_semantics<parallel>], iteration_bounds = array<i64: 1, 1>, scalar_prefetch = 0 : i64, scratch_operands = 0 : i64, tpu.core_type = #tpu.core_type<tc>, window_params = [{transform_indices = @transform_0, window_bounds = array<i64: 2, 128, 128>}, {transform_indices = @transform_1, window_bounds = array<i64: 2, 128, 128>}, {transform_indices = @transform_2, window_bounds = array<i64: 2, 1, 128>}, {transform_indices = @transform_3, window_bounds = array<i64: 8, 128>}, {transform_indices = @transform_4, window_bounds = array<i64: 2, 8, 128>}]} {
    %c0 = arith.constant 0 : index
    %c0_0 = arith.constant 0 : index
    %0 = vector.load %arg5[%c0, %c0_0] : memref<8x128xbf16, #tpu.memory_space<vmem>>, vector<8x128xbf16>
    %c0_1 = arith.constant 0 : index
    %c0_2 = arith.constant 0 : index
    %c0_3 = arith.constant 0 : index
    %1 = vector.load %arg3[%c0_1, %c0_2, %c0_3] : memref<2x128x128xbf16, #tpu.memory_space<vmem>>, vector<1x128x128xbf16>
    %2 = vector.shape_cast %1 : vector<1x128x128xbf16> to vector<128x128xbf16>
    %cst = arith.constant dense<0.000000e+00> : vector<8x128xf32>
    %3 = tpu.matmul %0, %2, %cst {dimension_numbers = #tpu.dot_dimension_numbers<[1], [0], [0], [1], [0, 0, 1, 1], [], []>} : vector<8x128xbf16>, vector<128x128xbf16>, vector<8x128xf32> -> vector<8x128xf32>
    %c0_4 = arith.constant 0 : index
    %c0_5 = arith.constant 0 : index
    %c0_6 = arith.constant 0 : index
    %4 = vector.load %arg4[%c0_4, %c0_5, %c0_6] : memref<2x1x128xf32, #tpu.memory_space<vmem>>, vector<1x1x128xf32>
    %5 = vector.shape_cast %4 : vector<1x1x128xf32> to vector<1x128xf32>
    %6 = vector.broadcast %5 : vector<1x128xf32> to vector<8x128xf32>
    %7 = arith.addf %3, %6 : vector<8x128xf32>
    %cst_7 = arith.constant dense<0xFF800000> : vector<8xf32>
    %8 = vector.multi_reduction <maximumf>, %7, %cst_7 [1] : vector<8x128xf32> to vector<8xf32>
    %9 = vector.shape_cast %8 : vector<8xf32> to vector<8x1xf32>
    %10 = vector.broadcast %9 : vector<8x1xf32> to vector<8x128xf32>
    %11 = arith.subf %7, %10 : vector<8x128xf32>
    %12 = math.exp %11 : vector<8x128xf32>
    %cst_8 = arith.constant dense<0.000000e+00> : vector<8xf32>
    %13 = vector.multi_reduction <add>, %12, %cst_8 [1] : vector<8x128xf32> to vector<8xf32>
    %14 = vector.shape_cast %13 : vector<8xf32> to vector<8x1xf32>
    %15 = arith.truncf %12 : vector<8x128xf32> to vector<8x128xbf16>
    %c0_9 = arith.constant 0 : index
    %c0_10 = arith.constant 0 : index
    %c0_11 = arith.constant 0 : index
    %16 = vector.load %arg2[%c0_9, %c0_10, %c0_11] : memref<2x128x128xbf16, #tpu.memory_space<vmem>>, vector<1x128x128xbf16>
    %17 = vector.shape_cast %16 : vector<1x128x128xbf16> to vector<128x128xbf16>
    %cst_12 = arith.constant dense<0.000000e+00> : vector<8x128xf32>
    %18 = tpu.matmul %15, %17, %cst_12 {dimension_numbers = #tpu.dot_dimension_numbers<[1], [0], [0], [1], [0, 0, 1, 1], [], []>} : vector<8x128xbf16>, vector<128x128xbf16>, vector<8x128xf32> -> vector<8x128xf32>
    %19 = tpu.reciprocal %14 {approx = true} : vector<8x1xf32> -> vector<8x1xf32>
    %20 = vector.broadcast %19 : vector<8x1xf32> to vector<8x128xf32>
    %21 = arith.mulf %18, %20 : vector<8x128xf32>
    %c0_13 = arith.constant 0 : index
    %c0_14 = arith.constant 0 : index
    %c0_15 = arith.constant 0 : index
    %22 = vector.load %arg6[%c0_13, %c0_14, %c0_15] : memref<2x8x128xf32, #tpu.memory_space<vmem>>, vector<1x8x128xf32>
    %23 = vector.shape_cast %22 : vector<1x8x128xf32> to vector<8x128xf32>
    %24 = vector.shape_cast %21 : vector<8x128xf32> to vector<1x8x128xf32>
    tpu.vector_store %arg6[%c0_13, %c0_14, %c0_15], %24 {strides = array<i32>} : memref<2x8x128xf32, #tpu.memory_space<vmem>>, vector<1x8x128xf32>,
    %c1 = arith.constant 1 : index
    %c0_16 = arith.constant 0 : index
    %c0_17 = arith.constant 0 : index
    %25 = vector.load %arg3[%c1, %c0_16, %c0_17] : memref<2x128x128xbf16, #tpu.memory_space<vmem>>, vector<1x128x128xbf16>
    %26 = vector.shape_cast %25 : vector<1x128x128xbf16> to vector<128x128xbf16>
    %cst_18 = arith.constant dense<0.000000e+00> : vector<8x128xf32>
    %27 = tpu.matmul %0, %26, %cst_18 {dimension_numbers = #tpu.dot_dimension_numbers<[1], [0], [0], [1], [0, 0, 1, 1], [], []>} : vector<8x128xbf16>, vector<128x128xbf16>, vector<8x128xf32> -> vector<8x128xf32>
    %c1_19 = arith.constant 1 : index
    %c0_20 = arith.constant 0 : index
    %c0_21 = arith.constant 0 : index
    %28 = vector.load %arg4[%c1_19, %c0_20, %c0_21] : memref<2x1x128xf32, #tpu.memory_space<vmem>>, vector<1x1x128xf32>
    %29 = vector.shape_cast %28 : vector<1x1x128xf32> to vector<1x128xf32>
    %30 = vector.broadcast %29 : vector<1x128xf32> to vector<8x128xf32>
    %31 = arith.addf %27, %30 : vector<8x128xf32>
    %cst_22 = arith.constant dense<0xFF800000> : vector<8xf32>
    %32 = vector.multi_reduction <maximumf>, %31, %cst_22 [1] : vector<8x128xf32> to vector<8xf32>
    %33 = vector.shape_cast %32 : vector<8xf32> to vector<8x1xf32>
    %34 = vector.broadcast %33 : vector<8x1xf32> to vector<8x128xf32>
    %35 = arith.subf %31, %34 : vector<8x128xf32>
    %36 = math.exp %35 : vector<8x128xf32>
    %cst_23 = arith.constant dense<0.000000e+00> : vector<8xf32>
    %37 = vector.multi_reduction <add>, %36, %cst_23 [1] : vector<8x128xf32> to vector<8xf32>
    %38 = vector.shape_cast %37 : vector<8xf32> to vector<8x1xf32>
    %39 = arith.truncf %36 : vector<8x128xf32> to vector<8x128xbf16>
    %c1_24 = arith.constant 1 : index
    %c0_25 = arith.constant 0 : index
    %c0_26 = arith.constant 0 : index
    %40 = vector.load %arg2[%c1_24, %c0_25, %c0_26] : memref<2x128x128xbf16, #tpu.memory_space<vmem>>, vector<1x128x128xbf16>
    %41 = vector.shape_cast %40 : vector<1x128x128xbf16> to vector<128x128xbf16>
    %cst_27 = arith.constant dense<0.000000e+00> : vector<8x128xf32>
    %42 = tpu.matmul %39, %41, %cst_27 {dimension_numbers = #tpu.dot_dimension_numbers<[1], [0], [0], [1], [0, 0, 1, 1], [], []>} : vector<8x128xbf16>, vector<128x128xbf16>, vector<8x128xf32> -> vector<8x128xf32>
    %43 = tpu.reciprocal %38 {approx = true} : vector<8x1xf32> -> vector<8x1xf32>
    %44 = vector.broadcast %43 : vector<8x1xf32> to vector<8x128xf32>
    %45 = arith.mulf %42, %44 : vector<8x128xf32>
    %c1_28 = arith.constant 1 : index
    %c0_29 = arith.constant 0 : index
    %c0_30 = arith.constant 0 : index
    %46 = vector.load %arg6[%c1_28, %c0_29, %c0_30] : memref<2x8x128xf32, #tpu.memory_space<vmem>>, vector<1x8x128xf32>
    %47 = vector.shape_cast %46 : vector<1x8x128xf32> to vector<8x128xf32>
    %48 = vector.shape_cast %45 : vector<8x128xf32> to vector<1x8x128xf32>
    tpu.vector_store %arg6[%c1_28, %c0_29, %c0_30], %48 {strides = array<i32>} : memref<2x8x128xf32, #tpu.memory_space<vmem>>, vector<1x8x128xf32>,
    return
  }
  func.func @transform_0(%arg0: i32, %arg1: i32) -> (i32, i32, i32) {
    %c0_i32 = arith.constant 0 : i32
    %c0_i32_0 = arith.constant 0 : i32
    %c0_i32_1 = arith.constant 0 : i32
    return %arg0, %c0_i32, %c0_i32_0 : i32, i32, i32
  }
  func.func @transform_1(%arg0: i32, %arg1: i32) -> (i32, i32, i32) {
    %c0_i32 = arith.constant 0 : i32
    %c0_i32_0 = arith.constant 0 : i32
    %c0_i32_1 = arith.constant 0 : i32
    return %arg0, %c0_i32, %c0_i32_0 : i32, i32, i32
  }
  func.func @transform_2(%arg0: i32, %arg1: i32) -> (i32, i32, i32) {
    %c0_i32 = arith.constant 0 : i32
    %c0_i32_0 = arith.constant 0 : i32
    %c0_i32_1 = arith.constant 0 : i32
    return %arg0, %c0_i32, %c0_i32_0 : i32, i32, i32
  }
  func.func @transform_3(%arg0: i32, %arg1: i32) -> (i32, i32) {
    %c0_i32 = arith.constant 0 : i32
    %c0_i32_0 = arith.constant 0 : i32
    return %arg1, %c0_i32 : i32, i32
  }
  func.func @transform_4(%arg0: i32, %arg1: i32) -> (i32, i32, i32) {
    %c0_i32 = arith.constant 0 : i32
    %c0_i32_0 = arith.constant 0 : i32
    return %arg0, %arg1, %c0_i32 : i32, i32, i32
  }
}

</mosaic_0001>

<bundles_post_ra>
// kernel: ml_attention.1
= control target key start
LH: loop header
LB: loop body
LE: loop exit
PB: predicated region body
PF: predicated region fallthrough
CT: control target
= control target key end

     0   :  { %v742_v1 = vmov 0.0   ;;  %vm743_vm0 = vmmov 0   ;;  %s920_s0 = inlined_call_operand.vmem [shape: bf16[2,128,128], index: 0, kind: input, shape index: {}]   ;;  %s921_s1 = inlined_call_operand.vmem [shape: bf16[2,128,128], index: 1, kind: input, shape index: {}]   ;;  %s922_s2 = inlined_call_operand.vmem [shape: f32[2,1,128], index: 2, kind: input, shape index: {}]   ;;  %s923_s3 = inlined_call_operand.vmem [shape: bf16[8,128], index: 3, kind: input, shape index: {}]   ;;  %s924_s4 = inlined_call_operand.hbm [shape: f32[2,8,128], index: 4, kind: output, shape index: {}]  }
   0x1   :  { %v680_v0 = vld [vmem:[%s921_s1 + $0x38] sm:$0xff]   ;;  %595 = vmatprep.subr.bf16.mxu0 %v742_v1  ;;  %615 = vmatprep.subr.bf16.mxu1 %v742_v1  ;;  %v681_v2 = vld [vmem:[%s921_s1 + $0x30] sm:$0xff]   ;;  %v682_v3 = vld [vmem:[%s921_s1 + $0x28] sm:$0xff]  }
   0x2   :  { %596 = vmatpush3.bf16.msra.mxu0 %v680_v0  ;;  %611 = vmatprep.mubr.msk.bf16.mxu0 %vm743_vm0, %v742_v1  ;;  %v683_v4 = vld [vmem:[%s921_s1 + $0x20] sm:$0xff]   ;;  %v684_v5 = vld [vmem:[%s921_s1 + $0x18] sm:$0xff]   ;;  %v685_v6 = vld [vmem:[%s921_s1 + $0x10] sm:$0xff]  }
   0x3   :  { %597 = vmatprep.subr.bf16.mxu0 %v742_v1  ;;  %631 = vmatprep.mubr.msk.bf16.mxu1 %vm743_vm0, %v742_v1  ;;  %v686_v7 = vld [vmem:[%s921_s1 + $0x8] sm:$0xff]   ;;  %v687_v8 = vld [vmem:[%s921_s1] sm:$0xff]  }
   0x6   :  { %598 = vmatpush3.bf16.msra.mxu0 %v681_v2 }
   0x7   :  { %599 = vmatprep.subr.bf16.mxu0 %v742_v1 }
   0xa   :  { %600 = vmatpush3.bf16.msra.mxu0 %v682_v3 }
   0xb   :  { %601 = vmatprep.subr.bf16.mxu0 %v742_v1 }
   0xe   :  { %602 = vmatpush3.bf16.msra.mxu0 %v683_v4 }
   0xf   :  { %603 = vmatprep.subr.bf16.mxu0 %v742_v1 }
  0x12   :  { %604 = vmatpush3.bf16.msra.mxu0 %v684_v5 }
  0x13   :  { %605 = vmatprep.subr.bf16.mxu0 %v742_v1 }
  0x16   :  { %606 = vmatpush3.bf16.msra.mxu0 %v685_v6 }
  0x17   :  { %607 = vmatprep.subr.bf16.mxu0 %v742_v1 }
  0x1a   :  { %608 = vmatpush3.bf16.msra.mxu0 %v686_v7 }
  0x1b   :  { %609 = vmatprep.subr.bf16.mxu0 %v742_v1 }
  0x1c   :  { %9 = vsyncpa [#allocation3], 0  ;;  %v19_v9 = vld [vmem:[%s923_s3] sm:$0xf]  ;;  %v688_v10 = vld [vmem:[%s921_s1 + $0x78] sm:$0xff]   ;;  %s744_s28 = smov [#allocation2]  }
  0x1d   :  { %v689_v11 = vld [vmem:[%s921_s1 + $0x70] sm:$0xff]   ;;  %v690_v12 = vld [vmem:[%s921_s1 + $0x68] sm:$0xff]   ;;  %v691_v13 = vld [vmem:[%s921_s1 + $0x60] sm:$0xff]  }
  0x1e   :  { %610 = vmatpush3.bf16.msra.mxu0 %v687_v8  ;;  %v692_v14 = vld [vmem:[%s921_s1 + $0x58] sm:$0xff]   ;;  %v693_v15 = vld [vmem:[%s921_s1 + $0x50] sm:$0xff]   ;;  %v694_v16 = vld [vmem:[%s921_s1 + $0x48] sm:$0xff]  }
  0x1f   :  { %635 = vmatprep.subr.bf16.mxu0 %v742_v1  ;;  %v695_v17 = vld [vmem:[%s921_s1 + $0x40] sm:$0xff]   ;;  %v696_v18 = vld [vmem:[%s920_s0 + $0x38] sm:$0xff]   ;;  %v697_v19 = vld [vmem:[%s920_s0 + $0x30] sm:$0xff]  }
  0x20   :  { %616 = vmatpush3.bf16.msra.mxu1 %v696_v18  ;;  %v698_v20 = vld [vmem:[%s920_s0 + $0x28] sm:$0xff]   ;;  %v492_v21 = vld [vmem:[%s922_s2] ss:$0 sm:$0xff]  ;;  %v700_v28 = vld [vmem:[%s920_s0 + $0x18] sm:$0xff]  }
  0x21   :  { %612 = vmatmul.mubr.bf16.vlgmr.msra.gmra.mxu0 %v19_v9  ;;  %617 = vmatprep.subr.bf16.mxu1 %v742_v1  ;;  %v699_v27 = vld [vmem:[%s920_s0 + $0x20] sm:$0xff]   ;;  %v701_v29 = vld [vmem:[%s920_s0 + $0x10] sm:$0xff]   ;;  %v702_v30 = vld [vmem:[%s920_s0 + $0x8] sm:$0xff]  }
  0x22   :  { %636 = vmatpush3.bf16.msra.mxu0 %v688_v10  ;;  %651 = vmatprep.mubr.msk.bf16.mxu0 %vm743_vm0, %v742_v1  ;;  %v703_v31 = vld [vmem:[%s920_s0] sm:$0xff]   ;;  %v704_v42 = vld [vmem:[%s920_s0 + $0x78] sm:$0xff]   ;;  %v705_v44 = vld [vmem:[%s920_s0 + $0x70] sm:$0xff]  }
  0x23   :  { %637 = vmatprep.subr.bf16.mxu0 %v742_v1  ;;  %v526_v32 = vld [vmem:[%s922_s2 + $0x1] ss:$0 sm:$0xff]  ;;  %v706_v45 = vld [vmem:[%s920_s0 + $0x68] sm:$0xff]   ;;  %v708_v49 = vld [vmem:[%s920_s0 + $0x58] sm:$0xff]  }
  0x24   :  { %618 = vmatpush3.bf16.msra.mxu1 %v697_v19  ;;  %v707_v46 = vld [vmem:[%s920_s0 + $0x60] sm:$0xff]   ;;  %v709_v51 = vld [vmem:[%s920_s0 + $0x50] sm:$0xff]   ;;  %v710_v52 = vld [vmem:[%s920_s0 + $0x48] sm:$0xff]  }
  0x25   :  { %619 = vmatprep.subr.bf16.mxu1 %v742_v1  ;;  %v711_v53 = vld [vmem:[%s920_s0 + $0x40] sm:$0xff]   ;;  %s481_s0 = sshll.u32 %s744_s28, 4  ;;  %s482_s0 = int_to_ptr.vmem [resolvable:$true] %s481_s0 }
  0x26   :  { %638 = vmatpush3.bf16.msra.mxu0 %v689_v11  ;;  %s720_s29 = scalar_lea.vmem %s482_s0, 256  ;;  %p725_p1 = scmp.lt.s32.totalorder %s482_s0, %s482_s0 }
  0x27   :  { %639 = vmatprep.subr.bf16.mxu0 %v742_v1  ;;  %p721_p0 = scmp.ne.s32.totalorder %s482_s0, %s720_s29  ;;  %p726_p2 = scmp.lt.s32.totalorder %s720_s29, %s720_s29 }
  0x28   :  { %620 = vmatpush3.bf16.msra.mxu1 %v698_v20 }
  0x29   :  { %621 = vmatprep.subr.bf16.mxu1 %v742_v1  ;;  %p727_p3 = por %p726_p2, %p725_p1 }
  0x2a   :  { %640 = vmatpush3.bf16.msra.mxu0 %v690_v12 }
  0x2b   :  { %641 = vmatprep.subr.bf16.mxu0 %v742_v1  ;;  %p728_p4 = pnand %p727_p3, %p721_p0 }
  0x2c   :  { %622 = vmatpush3.bf16.msra.mxu1 %v699_v27 }
  0x2d   :  { %623 = vmatprep.subr.bf16.mxu1 %v742_v1 }
  0x2e   :  { %642 = vmatpush3.bf16.msra.mxu0 %v691_v13 }
  0x2f   :  { %643 = vmatprep.subr.bf16.mxu0 %v742_v1 }
  0x30   :  { %624 = vmatpush3.bf16.msra.mxu1 %v700_v28 }
  0x31   :  { %625 = vmatprep.subr.bf16.mxu1 %v742_v1 }
  0x32   :  { %644 = vmatpush3.bf16.msra.mxu0 %v692_v14 }
  0x33   :  { %645 = vmatprep.subr.bf16.mxu0 %v742_v1 }
  0x34   :  { %626 = vmatpush3.bf16.msra.mxu1 %v701_v29 }
  0x35   :  { %627 = vmatprep.subr.bf16.mxu1 %v742_v1 }
  0x36   :  { %646 = vmatpush3.bf16.msra.mxu0 %v693_v15 }
  0x37   :  { %647 = vmatprep.subr.bf16.mxu0 %v742_v1 }
  0x38   :  { %628 = vmatpush3.bf16.msra.mxu1 %v702_v30 }
  0x39   :  { %629 = vmatprep.subr.bf16.mxu1 %v742_v1 }
  0x3a   :  { %648 = vmatpush3.bf16.msra.mxu0 %v694_v16 }
  0x3b   :  { %649 = vmatprep.subr.bf16.mxu0 %v742_v1 }
  0x3c   :  { %630 = vmatpush3.bf16.msra.mxu1 %v703_v31 }
  0x3d   :  { %655 = vmatprep.subr.bf16.mxu1 %v742_v1 }
  0x3e   :  { %650 = vmatpush3.bf16.msra.mxu0 %v695_v17 }
  0x41   :  { %652 = vmatmul.mubr.bf16.vlgmr.msra.gmra.mxu0 %v19_v9 }
  0xe1   :  { %v125_v22 = vpop.f32.mrf.mxu0 }
  0xe2   :  { %v126_v23 = vadd.f32 %v492_v21, %v125_v22 }
  0xe3   :  { %v613_v24 = vpop.f32.mrf.mxu0 }
  0xe4   :  { %131 = vmax.xlane.f32.xlu0 %v126_v23 }
  0xe5   :  { %v128_v25 = vpop.f32.mrf.mxu0 }
  0xe7   :  { %v614_v26 = vpop.f32.mrf.mxu0 }
 0x101   :  { %v353_v33 = vpop.f32.mrf.mxu0 }
 0x102   :  { %v354_v34 = vadd.f32 %v526_v32, %v353_v33 }
 0x103   :  { %v653_v35 = vpop.f32.mrf.mxu0 }
 0x104   :  { %359 = vmax.xlane.f32.xlu0 %v354_v34 }
 0x105   :  { %v356_v36 = vpop.f32.mrf.mxu0 }
 0x107   :  { %v654_v37 = vpop.f32.mrf.mxu0 }
 0x16d   :  { %v132_v38 = vpop.xlane.xlu0 %131 }
 0x16e   :  { %v133_v39 = vsub.f32 %v126_v23, %v132_v38 }
 0x170   :  { %v134_v40 = vmul.f32 1.442695, %v133_v39 }
 0x172   :  { %712 = vpow2.f32 %v134_v40 }
 0x17f   :  { %v713_v41 = vpop.eup %712 }
 0x180   :  { %136 = vadd.xlane.f32.xlu1 %v713_v41  ;;  %v138_v43 = vpack.c.bf16 %v713_v41, %v713_v41 }
 0x182   :  { %632 = vmatmul.mubr.bf16.vlgmr.msra.gmra.mxu1 %v138_v43 }
 0x183   :  { %656 = vmatpush3.bf16.msra.mxu1 %v704_v42  ;;  %671 = vmatprep.mubr.msk.bf16.mxu1 %vm743_vm0, %v742_v1 }
 0x184   :  { %657 = vmatprep.subr.bf16.mxu1 %v742_v1 }
 0x187   :  { %658 = vmatpush3.bf16.msra.mxu1 %v705_v44 }
 0x188   :  { %659 = vmatprep.subr.bf16.mxu1 %v742_v1 }
 0x18b   :  { %660 = vmatpush3.bf16.msra.mxu1 %v706_v45 }
 0x18c   :  { %661 = vmatprep.subr.bf16.mxu1 %v742_v1 }
 0x18d   :  { %v360_v47 = vpop.xlane.xlu0 %359 }
 0x18e   :  { %v361_v48 = vsub.f32 %v354_v34, %v360_v47 }
 0x18f   :  { %662 = vmatpush3.bf16.msra.mxu1 %v707_v46 }
 0x190   :  { %v362_v50 = vmul.f32 1.442695, %v361_v48  ;;  %663 = vmatprep.subr.bf16.mxu1 %v742_v1 }
 0x192   :  { %714 = vpow2.f32 %v362_v50 }
 0x193   :  { %664 = vmatpush3.bf16.msra.mxu1 %v708_v49 }
 0x194   :  { %665 = vmatprep.subr.bf16.mxu1 %v742_v1 }
 0x197   :  { %666 = vmatpush3.bf16.msra.mxu1 %v709_v51 }
 0x198   :  { %667 = vmatprep.subr.bf16.mxu1 %v742_v1 }
 0x19b   :  { %668 = vmatpush3.bf16.msra.mxu1 %v710_v52 }
 0x19c   :  { %669 = vmatprep.subr.bf16.mxu1 %v742_v1 }
 0x19f   :  { %v715_v54 = vpop.eup %714  ;;  %670 = vmatpush3.bf16.msra.mxu1 %v711_v53 }
 0x1a0   :  { %364 = vadd.xlane.f32.xlu1 %v715_v54  ;;  %v366_v55 = vpack.c.bf16 %v715_v54, %v715_v54 }
 0x1a2   :  { %672 = vmatmul.mubr.bf16.vlgmr.msra.gmra.mxu1 %v366_v55 }
 0x209   :  { %v137_v56 = vpop.xlane.xlu1 %136 }
 0x20a   :  { %716 = vrcp.f32 %v137_v56 }
 0x217   :  { %v717_v57 = vpop.eup %716 }
 0x229   :  { %v365_v63 = vpop.xlane.xlu1 %364 }
 0x22a   :  { %718 = vrcp.f32 %v365_v63 }
 0x237   :  { %v719_v0 = vpop.eup %718 }
 0x242   :  { %v237_v58 = vpop.f32.mrf.mxu1 }
 0x243   :  { %v244_v59 = vmul.f32 %v717_v57, %v237_v58 }
 0x244   :  { %v633_v60 = vpop.f32.mrf.mxu1 }
 0x245   :  { %245 = vst [vmem:[#allocation2] sm:$0xff] %v244_v59 }
 0x246   :  { %v240_v61 = vpop.f32.mrf.mxu1 }
 0x248   :  { %v634_v62 = vpop.f32.mrf.mxu1 }
 0x262   :  { %v466_v1 = vpop.f32.mrf.mxu1 }
 0x263   :  { %v473_v2 = vmul.f32 %v719_v0, %v466_v1 }
 0x264   :  { %v673_v3 = vpop.f32.mrf.mxu1 }
 0x265   :  { %475 = vst [vmem:[#allocation2 + $0x8] sm:$0xff] %v473_v2 }
 0x266   :  { %v469_v4 = vpop.f32.mrf.mxu1 }
 0x267   :  { %731 = shalt.err (!%p728_p4)
}
 0x268   :  { %s745_s30 = smov 128   ;;  %s746_s5 = smov 8   ;;  %v674_v5 = vpop.f32.mrf.mxu1 }
 0x269   :  { %487 = dma.vmem_to_hbm [thread:$0]  %s482_s0, 256, %s924_s4, [#allocation3], %s745_s30, %s745_s30, %s746_s5  }
 0x26a   :  { %740 = dma.done.wait [#allocation3], 256  }
 0x26b   :  { %741 = vsyncadd [#allocation3], 4294967040 }
 0x26c   :  { %491 = vsyncpa [#allocation3], 1 }

</bundles_post_ra>
